<compile_context>
chip_gen: v7x
topology: tpu7x:2x2x1
jax: 0.10.0
libtpu: 0.0.40
codegen_flags: <defaults>
</compile_context>

<pallas_src>
import functools

import jax
import jax.numpy as jnp
from jax.experimental import pallas as pl
from jax.experimental.pallas import tpu as pltpu


def _conv_bn_kernel(x_ref, w_ref, b_ref, o_ref, *, num_t, TH, Wp, KH, KW, Cin):
    """One image per grid step.

    x_ref: (1, Cin, Lp)        bf16 padded image, CHW-flattened (Lp = rows * Wp, lane axis)
    w_ref: (Cout, K)           bf16 BN-folded weights, K = KH*KW*Cin (tap-major, cin fastest)
    b_ref: (Cout, 1)           f32  BN bias (beta - mean*scale)
    o_ref: (1, Cout, Mtot)     f32  NCHW-flattened output, Mtot = Hout_p * Wp
    """
    M = TH * Wp
    w = w_ref[...]                                  # (Cout, K) bf16, loaded once
    b = b_ref[...]                                  # (Cout, 1) f32

    # Static (unrolled) row-tile loop: bounds the per-tile matmul M and the f32 accumulator.
    for t in range(num_t):
        base = t * TH * Wp
        taps = []
        for kh in range(KH):
            for kw in range(KW):
                s = base + kh * Wp + kw
                # Contiguous lane slice of the flattened image == tap (kh, kw) for all Cin.
                taps.append(x_ref[0, :, s:s + M])   # (Cin, M) bf16
        patches = jnp.concatenate(taps, axis=0)     # (K, M)  — sublane stack, contraction contiguous

        acc = jnp.dot(w, patches,
                      preferred_element_type=jnp.float32)   # (Cout, M) on the MXU
        o_ref[0, :, base:base + M] = (acc + b).astype(o_ref.dtype)


def _round_up(v, m):
    return ((v + m - 1) // m) * m


def basic_conv2d(x_nchw, weight, gamma, beta, running_mean, running_var,
                 *, stride=1, padding=0, dilation=1, eps=1e-5, row_tile=None):
    """Pallas implementation of BasicConv2d.forward (conv -> bn, no relu).

    x_nchw:  (N, Cin, H, W)        float32
    weight:  (Cout, Cin, KH, KW)   float32 (PyTorch layout)
    returns: (N, Cout, Hout, Wout) float32
    """
    if stride != 1 or dilation != 1:
        raise NotImplementedError("kernel supports stride=1, dilation=1")

    N, Cin, H, W = x_nchw.shape
    Cout, _, KH, KW = weight.shape
    Hout = H + 2 * padding - (KH - 1)
    Wout = W + 2 * padding - (KW - 1)
    Wp = W + 2 * padding                              # padded width (row stride in flat layout)

    # Row tiling (in-kernel, static).  Default: whole image in one matmul (best for the small
    # shapes here and amortizes per-step overhead on v5e/v6e); row_tile caps the per-tile M
    # (accumulator / relayout working set) when images are tall.
    TH = Hout if row_tile is None else max(1, min(Hout, int(row_tile)))
    num_t = pl.cdiv(Hout, TH)
    Hout_p = num_t * TH                               # output rows padded to a multiple of TH
    Mtot = Hout_p * Wp                                # flattened output per image (full-width rows)

    # Padded input rows: taps read rows [0, Hout_p + KH - 1); one extra zero row covers the
    # (KW-1)-lane overhang of the last tap's contiguous slab.
    Hpad_total = Hout_p + KH
    Lp = Hpad_total * Wp

    # ---- wrapper prep (plain JAX): bf16 cast FIRST, then a single pad, free flatten ----
    x_b = x_nchw.astype(jnp.bfloat16)
    x_pad = jnp.pad(
        x_b,
        ((0, 0), (0, 0),
         (padding, Hpad_total - H - padding),         # bottom pad: conv pad + tile pad + 1 row
         (padding, padding)))
    x_flat = x_pad.reshape(N, Cin, Lp)                # CHW-flattened; lane axis = Hp*Wp

    # Eval-mode BN folded into the conv weights (scale) + a single bias.
    inv_std = 1.0 / jnp.sqrt(running_var.astype(jnp.float32) + eps)
    scale = gamma.astype(jnp.float32) * inv_std                        # (Cout,)
    bias = beta.astype(jnp.float32) - running_mean.astype(jnp.float32) * scale
    K = KH * KW * Cin
    w_mat = (jnp.transpose(weight, (0, 2, 3, 1)).reshape(Cout, K)      # (Cout, KH*KW*Cin)
             * scale[:, None]).astype(jnp.bfloat16)
    b_mat = bias.reshape(Cout, 1)                                      # f32

    kernel = functools.partial(_conv_bn_kernel, num_t=num_t, TH=TH, Wp=Wp,
                               KH=KH, KW=KW, Cin=Cin)

    # Advisory cost estimate for the XLA scheduler.
    flops = 2 * N * Mtot * K * Cout
    bytes_accessed = (N * Cin * Lp * 2) + (Cout * K * 2) + (Cout * 4) + (N * Cout * Mtot * 4)
    cost = pl.CostEstimate(flops=int(flops), transcendentals=0,
                           bytes_accessed=int(bytes_accessed))

    # Explicit per-step VMEM accounting (double-buffered input + output slabs + weights),
    # rounded to (sublane, 128) tiles; keeps v7x's 64 MiB in mind.
    in_bytes = _round_up(Cin, 16) * _round_up(Lp, 128) * 2
    out_bytes = _round_up(Cout, 8) * _round_up(Mtot, 128) * 4
    w_bytes = _round_up(Cout, 16) * _round_up(K, 128) * 2
    b_bytes = _round_up(Cout, 8) * 128 * 4
    vmem_est = 2 * (in_bytes + out_bytes) + w_bytes + b_bytes
    vmem_limit = int(max(32 * 2 ** 20, min(64 * 2 ** 20, 4 * vmem_est)))

    out_flat = pl.pallas_call(
        kernel,
        out_shape=jax.ShapeDtypeStruct((N, Cout, Mtot), jnp.float32),
        grid_spec=pltpu.PrefetchScalarGridSpec(
            num_scalar_prefetch=0,
            grid=(N,),
            in_specs=[
                pl.BlockSpec((1, Cin, Lp), lambda n: (n, 0, 0)),
                pl.BlockSpec((Cout, K), lambda n: (0, 0)),
                pl.BlockSpec((Cout, 1), lambda n: (0, 0)),
            ],
            out_specs=pl.BlockSpec((1, Cout, Mtot), lambda n: (n, 0, 0)),
        ),
        compiler_params=pltpu.CompilerParams(
            dimension_semantics=("parallel",),       # N=2 splits evenly over v7x's 2 TCs
            vmem_limit_bytes=vmem_limit),
        cost_estimate=cost,
    )(x_flat, w_mat, b_mat)

    # Already NCHW-ordered: free reshape, then drop the padded rows / halo columns.
    out = out_flat.reshape(N, Cout, Hout_p, Wp)[:, :, :Hout, :Wout]
    return out


def _reference(x_nchw, weight, gamma, beta, running_mean, running_var,
               *, padding, eps=1e-5):
    """Pure-JAX f32 reference (lax conv + eval-mode BN) for correctness check."""
    y = jax.lax.conv_general_dilated(
        x_nchw, weight, window_strides=(1, 1),
        padding=[(padding, padding), (padding, padding)],
        dimension_numbers=("NCHW", "OIHW", "NCHW"))
    inv_std = 1.0 / jnp.sqrt(running_var + eps)
    scale = (gamma * inv_std)[None, :, None, None]
    shift = (beta - running_mean * gamma * inv_std)[None, :, None, None]
    return y * scale + shift


if __name__ == "__main__":
    # BasicConv2d(in_planes=4, out_planes=8, kernel_size=3, padding=1)
    N, Cin, H, W = 2, 4, 16, 16
    Cout, Kk, pad = 8, 3, 1

    key = jax.random.PRNGKey(0)
    kx, kw, kg, kb, km, kv = jax.random.split(key, 6)

    x = jax.random.normal(kx, (N, Cin, H, W), dtype=jnp.float32)
    weight = jax.random.normal(kw, (Cout, Cin, Kk, Kk), dtype=jnp.float32) * 0.1
    gamma = 1.0 + 0.1 * jax.random.normal(kg, (Cout,), dtype=jnp.float32)
    beta = 0.1 * jax.random.normal(kb, (Cout,), dtype=jnp.float32)
    running_mean = 0.05 * jax.random.normal(km, (Cout,), dtype=jnp.float32)
    running_var = 1.0 + 0.1 * jax.random.uniform(kv, (Cout,), dtype=jnp.float32)

    ref = _reference(x, weight, gamma, beta, running_mean, running_var, padding=pad)

    # row_tile=None: whole image per step; 8: divisible row tiles; 5: non-divisible (exercises
    # bottom-row padding path).
    for rt in (None, 8, 5):
        out = basic_conv2d(x, weight, gamma, beta, running_mean, running_var,
                           stride=1, padding=pad, dilation=1, row_tile=rt)
        out = jax.block_until_ready(out)
        assert out.shape == (N, Cout, H, W), (rt, out.shape)
        # bf16 activations/weights with f32 accumulation -> loose tolerance vs. f32 reference.
        err = float(jnp.max(jnp.abs(out - ref)))
        assert jnp.allclose(out, ref, atol=3e-2, rtol=3e-2), (rt, err)

    print("KERNEL_OK")
</pallas_src>

<mosaic_0001>
module attributes {stable_mosaic.version = 11 : i64} {
  func.func @_conv_bn_kernel(%arg0: i32, %arg1: memref<1x4x342xbf16, #tpu.memory_space<vmem>>, %arg2: memref<8x36xbf16, #tpu.memory_space<vmem>>, %arg3: memref<8x1xf32, #tpu.memory_space<vmem>>, %arg4: memref<1x8x288xf32, #tpu.memory_space<vmem>>) attributes {dimension_semantics = [#tpu.dimension_semantics<parallel>], iteration_bounds = array<i64: 2>, scalar_prefetch = 0 : i64, scratch_operands = 0 : i64, tpu.core_type = #tpu.core_type<tc>, window_params = [{transform_indices = @transform_0, window_bounds = array<i64: 1, 4, 342>}, {pipeline_mode = #tpu.pipeline_mode<synchronous>, transform_indices = @transform_1, window_bounds = array<i64: 8, 36>}, {pipeline_mode = #tpu.pipeline_mode<synchronous>, transform_indices = @transform_2, window_bounds = array<i64: 8, 1>}, {transform_indices = @transform_3, window_bounds = array<i64: 1, 8, 288>}]} {
    %c0 = arith.constant 0 : index
    %c0_0 = arith.constant 0 : index
    %0 = vector.load %arg2[%c0, %c0_0] : memref<8x36xbf16, #tpu.memory_space<vmem>>, vector<8x36xbf16>
    %c0_1 = arith.constant 0 : index
    %c0_2 = arith.constant 0 : index
    %1 = vector.load %arg3[%c0_1, %c0_2] : memref<8x1xf32, #tpu.memory_space<vmem>>, vector<8x1xf32>
    %c0_3 = arith.constant 0 : index
    %c0_4 = arith.constant 0 : index
    %c0_5 = arith.constant 0 : index
    %2 = vector.load %arg1[%c0_3, %c0_4, %c0_5] : memref<1x4x342xbf16, #tpu.memory_space<vmem>>, vector<1x4x288xbf16>
    %3 = vector.shape_cast %2 : vector<1x4x288xbf16> to vector<4x288xbf16>
    %c0_6 = arith.constant 0 : index
    %c0_7 = arith.constant 0 : index
    %c1 = arith.constant 1 : index
    %4 = vector.load %arg1[%c0_6, %c0_7, %c1] : memref<1x4x342xbf16, #tpu.memory_space<vmem>>, vector<1x4x288xbf16>
    %5 = vector.shape_cast %4 : vector<1x4x288xbf16> to vector<4x288xbf16>
    %c0_8 = arith.constant 0 : index
    %c0_9 = arith.constant 0 : index
    %c2 = arith.constant 2 : index
    %6 = vector.load %arg1[%c0_8, %c0_9, %c2] : memref<1x4x342xbf16, #tpu.memory_space<vmem>>, vector<1x4x288xbf16>
    %7 = vector.shape_cast %6 : vector<1x4x288xbf16> to vector<4x288xbf16>
    %c0_10 = arith.constant 0 : index
    %c0_11 = arith.constant 0 : index
    %c18 = arith.constant 18 : index
    %8 = vector.load %arg1[%c0_10, %c0_11, %c18] : memref<1x4x342xbf16, #tpu.memory_space<vmem>>, vector<1x4x288xbf16>
    %9 = vector.shape_cast %8 : vector<1x4x288xbf16> to vector<4x288xbf16>
    %c0_12 = arith.constant 0 : index
    %c0_13 = arith.constant 0 : index
    %c19 = arith.constant 19 : index
    %10 = vector.load %arg1[%c0_12, %c0_13, %c19] : memref<1x4x342xbf16, #tpu.memory_space<vmem>>, vector<1x4x288xbf16>
    %11 = vector.shape_cast %10 : vector<1x4x288xbf16> to vector<4x288xbf16>
    %c0_14 = arith.constant 0 : index
    %c0_15 = arith.constant 0 : index
    %c20 = arith.constant 20 : index
    %12 = vector.load %arg1[%c0_14, %c0_15, %c20] : memref<1x4x342xbf16, #tpu.memory_space<vmem>>, vector<1x4x288xbf16>
    %13 = vector.shape_cast %12 : vector<1x4x288xbf16> to vector<4x288xbf16>
    %c0_16 = arith.constant 0 : index
    %c0_17 = arith.constant 0 : index
    %c36 = arith.constant 36 : index
    %14 = vector.load %arg1[%c0_16, %c0_17, %c36] : memref<1x4x342xbf16, #tpu.memory_space<vmem>>, vector<1x4x288xbf16>
    %15 = vector.shape_cast %14 : vector<1x4x288xbf16> to vector<4x288xbf16>
    %c0_18 = arith.constant 0 : index
    %c0_19 = arith.constant 0 : index
    %c37 = arith.constant 37 : index
    %16 = vector.load %arg1[%c0_18, %c0_19, %c37] : memref<1x4x342xbf16, #tpu.memory_space<vmem>>, vector<1x4x288xbf16>
    %17 = vector.shape_cast %16 : vector<1x4x288xbf16> to vector<4x288xbf16>
    %c0_20 = arith.constant 0 : index
    %c0_21 = arith.constant 0 : index
    %c38 = arith.constant 38 : index
    %18 = vector.load %arg1[%c0_20, %c0_21, %c38] : memref<1x4x342xbf16, #tpu.memory_space<vmem>>, vector<1x4x288xbf16>
    %19 = vector.shape_cast %18 : vector<1x4x288xbf16> to vector<4x288xbf16>
    %20 = tpu.concatenate %3, %5, %7, %9, %11, %13, %15, %17, %19 in 0 : vector<4x288xbf16>, vector<4x288xbf16>, vector<4x288xbf16>, vector<4x288xbf16>, vector<4x288xbf16>, vector<4x288xbf16>, vector<4x288xbf16>, vector<4x288xbf16>, vector<4x288xbf16> -> vector<36x288xbf16>
    %cst = arith.constant dense<0.000000e+00> : vector<8x288xf32>
    %21 = tpu.matmul %0, %20, %cst {dimension_numbers = #tpu.dot_dimension_numbers<[1], [0], [0], [1], [0, 0, 1, 1], [], []>} : vector<8x36xbf16>, vector<36x288xbf16>, vector<8x288xf32> -> vector<8x288xf32>
    %22 = vector.broadcast %1 : vector<8x1xf32> to vector<8x288xf32>
    %23 = arith.addf %21, %22 : vector<8x288xf32>
    %c0_22 = arith.constant 0 : index
    %c0_23 = arith.constant 0 : index
    %c0_24 = arith.constant 0 : index
    %24 = vector.load %arg4[%c0_22, %c0_23, %c0_24] : memref<1x8x288xf32, #tpu.memory_space<vmem>>, vector<1x8x288xf32>
    %25 = vector.shape_cast %24 : vector<1x8x288xf32> to vector<8x288xf32>
    %26 = vector.shape_cast %23 : vector<8x288xf32> to vector<1x8x288xf32>
    tpu.vector_store %arg4[%c0_22, %c0_23, %c0_24], %26 {strides = array<i32>} : memref<1x8x288xf32, #tpu.memory_space<vmem>>, vector<1x8x288xf32>,
    return
  }
  func.func @transform_0(%arg0: i32) -> (i32, i32, i32) {
    %c0_i32 = arith.constant 0 : i32
    %c0_i32_0 = arith.constant 0 : i32
    %c0_i32_1 = arith.constant 0 : i32
    return %arg0, %c0_i32, %c0_i32_0 : i32, i32, i32
  }
  func.func @transform_1(%arg0: i32) -> (i32, i32) {
    %c0_i32 = arith.constant 0 : i32
    %c0_i32_0 = arith.constant 0 : i32
    %c0_i32_1 = arith.constant 0 : i32
    return %c0_i32, %c0_i32_0 : i32, i32
  }
  func.func @transform_2(%arg0: i32) -> (i32, i32) {
    %c0_i32 = arith.constant 0 : i32
    %c0_i32_0 = arith.constant 0 : i32
    %c0_i32_1 = arith.constant 0 : i32
    return %c0_i32, %c0_i32_0 : i32, i32
  }
  func.func @transform_3(%arg0: i32) -> (i32, i32, i32) {
    %c0_i32 = arith.constant 0 : i32
    %c0_i32_0 = arith.constant 0 : i32
    %c0_i32_1 = arith.constant 0 : i32
    return %arg0, %c0_i32, %c0_i32_0 : i32, i32, i32
  }
}

</mosaic_0001>

<bundles_post_ra>
// kernel: tpu_custom_call.1
= control target key start
LH: loop header
LB: loop body
LE: loop exit
PB: predicated region body
PF: predicated region fallthrough
CT: control target
= control target key end

     0   :  { %8 = vsyncpa [#allocation3], 0  ;;  %s962_s0 = inlined_call_operand.hbm [shape: bf16[2,4,342], index: 0, kind: input, shape index: {}]   ;;  %s963_s1 = inlined_call_operand.vmem [shape: bf16[8,36], index: 1, kind: input, shape index: {}]   ;;  %s964_s2 = inlined_call_operand.vmem [shape: f32[8,1], index: 2, kind: input, shape index: {}]   ;;  %s965_s3 = inlined_call_operand.hbm [shape: f32[2,8,288], index: 3, kind: output, shape index: {}]  }
   0x1   :  { %10 = vsyncpa [#allocation3 + $0x1], 0 }
   0x2   :  { %11 = vsyncpa [#allocation4], 0 }
   0x3   :  { %13 = vsyncpa [#allocation4 + $0x1], 0  ;;  %s754_s12 = smov 0   ;;  %s756_s13 = smov 0  }
   0x4   :  { %s758_s14 = smov 0   ;;  %s760_s15 = smov 0  }
   0x5 LB: > { %s775_s16 = sadd.s32 4294967295, %s718_s15   ;;  %s531_s17 = sadd.s32 4294967294, %s718_s15   ;;  %s718_s15 = sphi %s760_s15, %s979_s15   ;;  %s714_s14 = sphi %s758_s14, %s978_s14   ;;  %s710_s13 = sphi %s756_s13, %s977_s13   ;;  %s706_s12 = sphi %s754_s12, %s976_s12  }
   0x6   : > { %s779_s18 = sadd.s32 1, %s718_s15   ;;  %s26_s19 = sadd.s32 1, %s714_s14 }
   0x7   : > { %s23_s20 = ssub.s32 %s718_s15, %s779_s18  ;;  %p33_p0 = scmp.ne.s32.totalorder %s714_s14, %s710_s13 }
   0x8   : > { %p24_p1 = scmp.eq.s32.totalorder %s23_s20, 0  ;;  %p34_p2 = scmp.eq.s32.totalorder %s718_s15, 0 }
   0x9   : > { %p39_p3 = scmp.ne.s32.totalorder %s710_s13, %s706_s12  ;;  %p40_p4 = scmp.eq.s32.totalorder %s775_s16, 0 }
   0xa   : > { %s791_s21 = scalar_select %p24_p1, %s714_s14, %s26_s19  }
   0xb   : > { %p35_p5 = por %p34_p2, %p33_p0  ;;  %p793_p6 = por %p40_p4, %p39_p3 }
   0xc   : > { %p105_p7 = scmp.eq.s32.totalorder %s775_s16, 1  ;;  %p111_p8 = scmp.eq.s32.totalorder %s531_s17, 1 }
   0xd   : > { %p573_p10 = scmp.lt.s32.totalorder %s718_s15, 2  ;;  %s137_s25 = sand.u32 1, %s714_s14  }
   0xe   : > { %p800_p11 = por %p105_p7, %p33_p0  ;;  %p804_p12 = por %p111_p8, %p39_p3 }
   0xf   : > { %s557_s26 = smul.u32 96, %s718_s15  ;;  %p815_p13 = pnand %p573_p10, %p35_p5 }
  0x10   : > { %s968_s23 = scalar_select %p800_p11, 1, 0 }
  0x11   : > { %s969_s24 = scalar_select %p804_p12, 1, 0 }
  0x12   : > { %s556_s27 = smul.u32 6, %s137_s25  ;;  %s813_s30 = scalar_lea.hbm %s962_s0, %s557_s26 }
  0x13   : > { %s138_s7 = scalar_lea.sflag [#allocation3], %s137_s25  ;;  %s622_s8 = scalar_lea.hbm %s813_s30, 96 }
  0x14   : > { %s141_s5 = scalar_lea.vmem [#allocation2], %s556_s27  ;;  %p623_p2 = scmp.ne.s32.totalorder %s813_s30, %s622_s8 }
  0x15   : > { %s149_s6 = sshll.u32 %s141_s5, 4  ;;  %p624_p3 = pneg %p815_p13  ;;  %s820_s6 = int_to_ptr.vmem [resolvable:$true] %s149_s6 }
  0x16   : > { %s627_s11 = scalar_lea.hbm %s962_s0, 192  ;;  %p628_p7 = scmp.lt.u32.totalorder %s813_s30, %s962_s0 }
  0x17   : > { %p625_p4 = pnand %p624_p3, %p623_p2  ;;  %p629_p8 = scmp.lt.u32.totalorder %s627_s11, %s622_s8 }
  0x18   : > { %p631_p9 = scmp.lt.u32.totalorder %s622_s8, %s813_s30 }
  0x19   : > { %p626_p5 = pneg %p625_p4  ;;  %p630_p10 = por %p629_p8, %p628_p7 }
  0x1b   : > { %p632_p0 = por %p631_p9, %p630_p10 }
  0x1d   : > { %p633_p1 = pnand %p632_p0, %p626_p5 }
  0x1f   : > { %636 = shalt.err (!%p633_p1)
}
  0x20   : > { %s637_s20 = scalar_lea.vmem %s820_s6, 96  ;;  %s720_s25 = smov [#allocation2]  }
  0x21   : > { %p638_p2 = scmp.ne.s32.totalorder %s820_s6, %s637_s20  ;;  %s642_s26 = sshll.u32 %s720_s25, 4  ;;  %s643_s26 = int_to_ptr.vmem [resolvable:$false] %s642_s26 }
  0x22   : > { %s644_s27 = scalar_lea.vmem %s643_s26, 192  ;;  %p645_p11 = scmp.lt.s32.totalorder %s820_s6, %s643_s26 }
  0x23   : > { %p640_p4 = pnand %p638_p2, %p624_p3  ;;  %p646_p7 = scmp.lt.s32.totalorder %s644_s27, %s637_s20 }
  0x25   : > { %p641_p12 = pneg %p640_p4  ;;  %p647_p8 = por %p646_p7, %p645_p11 }
  0x27   : > { %p648_p9 = pnand %p647_p8, %p641_p12 }
  0x29   : > { %651 = shalt.err (!%p648_p9)
}
  0x2a   : > { %568 = dma.hbm_to_vmem [thread:$0]  (!%p815_p13), %s813_s30, 96, %s820_s6, %s138_s7  }
  0x2b   : > { %p971_p0 = scmp.lt.s32.totalorder %s718_s15, 3  ;;  %p972_p1 = scmp.ge.s32.totalorder %s718_s15, 1 }
  0x2d   : > { %p155_p3 = pnand %p972_p1, %p971_p0 }
  0x2e   : > { %s853_s28 = sand.u32 (!%p155_p3), 1, %s710_s13  }
  0x2f   : > { %158 = sbr.rel (%p155_p3) target bundleno = 457 (0x1c9), region = 32  ;;  %s161_s5 = scalar_lea.sflag (!%p155_p3), [#allocation3], %s853_s28 }
  0x30   : > { %s558_s29 = smul.u32 (!%p155_p3), 6, %s853_s28 }
  0x32   : > { %s164_s8 = scalar_lea.vmem (!%p155_p3), [#allocation2], %s558_s29 }
  0x36   : > { %697 = dma.done.wait (%p793_p6), %s161_s5, 96  }
  0x37   : > { %699 = vsyncadd (%p793_p6), %s161_s5, 4294967200  ;;  %v196_v0 = vlaneseq  ;;  %v721_v1 = vmov 1983009808   ;;  %v190_v6 = vld [vmem:[%s164_s8] sm:$0x3f]  ;;  %s722_s30 = smov 126  }
  0x38   : > { %v194_v2 = vunpack.c.l.s4 %v721_v1  ;;  %v208_v8 = vcombine.low %v190_v6, %v190_v6  ;;  %s723_s4 = smov 127   ;;  %v192_v10 = vcombine.high %v190_v6, %v190_v6  ;;  %v724_v11 = vmov 0.0   ;;  %s725_s22 = smov 110   ;;  %v189_v19 = vld [vmem:[%s964_s2] sm:$0xff] }
  0x39   : > { %v197_v3 = vshrl.u32 %v196_v0, 7  ;;  %546 = vmatprep.subr.bf16.mxu1 %v724_v11  ;;  %s726_s6 = smov 109   ;;  %s727_s7 = smov 108   ;;  %vm729_vm0 = vmmov 0   ;;  %v730_v18 = vmov 0   ;;  %vm223_vm1 = vcmask 1039360  }
  0x3a   : > { %v195_v4 = vunpack.c.0.s8 %v194_v2  ;;  %s728_s9 = smov 92   ;;  %552 = vmatprep.mubr.msk.bf16.mxu1 %vm729_vm0, %v724_v11  ;;  %393 = vmatprep.mubr.bf16.mxu0 %v730_v18  ;;  %s731_s10 = smov 91   ;;  %vm292_vm2 = vcmask 1041408   ;;  %vm244_vm3 = vcmask 900096   ;;  %vm234_vm4 = vcmask 1031168  }
  0x3b   : > { %619 = vset.pattern.permute.xlu0 %v730_v18  ;;  %s732_s11 = smov 90   ;;  %vm309_vm5 = vcmask 1045504   ;;  %vm302_vm6 = vcmask 1043456   ;;  %vm262_vm7 = vcmask 883712   ;;  %vm271_vm8 = vcmask 752640   ;;  %s559_s26 = smul.u32 24, %s853_s28 }
  0x3c   : > { %v198_v5 = vsub.s32 %v195_v4, %v197_v3  ;;  %vm253_vm9 = vcmask 891904   ;;  %vm280_vm10 = vcmask 744448   ;;  %vm289_vm11 = vcmask 736256   ;;  %s560_s27 = smul.u32 384, %s775_s16  ;;  %p973_p11 = scmp.ne.s32.totalorder %s968_s23, 0 }
  0x3d   : > { %vm348_vm12 = vcmask 293888   ;;  %vm444_vm13 = vcmask 261120   ;;  %s186_s29 = scalar_lea.vmem [#allocation5], %s559_s26 }
  0x3e   : > { %v861_v7 = vrot.slane %v190_v6, %v198_v5  ;;  %v215_v9 = vrot.slane %v208_v8, %v198_v5  ;;  %v206_v14 = vrot.slane %v192_v10, %v198_v5  ;;  %s461_s5 = sshll.u32 %s186_s29, 4  ;;  %s918_s16 = scalar_lea.hbm %s965_s3, %s560_s27  ;;  %s920_s5 = int_to_ptr.vmem [resolvable:$true] %s461_s5 }
  0x40   : > { %230 = vrot.lane.b32.xlu1 %v861_v7, %s722_s30  ;;  %221 = vrot.lane.b32.xlu0 %v861_v7, %s723_s4  ;;  %v216_v12 = vcombine.high %v215_v9, %v215_v9  ;;  %v226_v13 = vcombine.low %v861_v7, %v861_v7  ;;  %v227_v15 = vcombine.low %v206_v14, %v206_v14 }
  0x41   : > { %v207_v16 = vcombine.high %v861_v7, %v861_v7  ;;  %v237_v17 = vcombine.low %v215_v9, %v215_v9 }
  0x44   : > { %217 = vrot.lane.b32.xlu1 %v215_v9, %s723_s4  ;;  %240 = vrot.lane.b32.xlu0 %v215_v9, %s725_s22 }
  0x48   : > { %219 = vrot.lane.b32.xlu0 %v216_v12, %s723_s4  ;;  %228 = vrot.lane.b32.xlu1 %v226_v13, %s722_s30  ;;  %s447_s4 = scalar_lea.sflag [#allocation4], %s853_s28 }
  0x4c   : > { %242 = vrot.lane.b32.xlu1 %v226_v13, %s725_s22  ;;  %232 = vrot.lane.b32.xlu0 %v227_v15, %s722_s30 }
  0x50   : > { %249 = vrot.lane.b32.xlu1 %v207_v16, %s726_s6  ;;  %238 = vrot.lane.b32.xlu0 %v237_v17, %s725_s22  ;;  %s652_s22 = scalar_lea.vmem %s920_s5, 384 }
  0x51   : > { %p653_p6 = scmp.ne.s32.totalorder %s920_s5, %s652_s22 }
  0x53   : > { %p654_p12 = pnand %p653_p6, %p973_p11 }
  0x54   : > { %258 = vrot.lane.b32.xlu1 %v216_v12, %s727_s7  ;;  %251 = vrot.lane.b32.xlu0 %v206_v14, %s726_s6 }
  0x55   : > { %p655_p13 = pneg %p654_p12 }
  0x58   : > { %247 = vrot.lane.b32.xlu1 %v861_v7, %s726_s6  ;;  %260 = vrot.lane.b32.xlu0 %v861_v7, %s727_s7  ;;  %s733_s6 = smov [#allocation5]  }
  0x5c   : > { %267 = vrot.lane.b32.xlu1 %v861_v7, %s728_s9  ;;  %256 = vrot.lane.b32.xlu0 %v215_v9, %s727_s7  ;;  %s656_s7 = sshll.u32 %s733_s6, 4  ;;  %s657_s7 = int_to_ptr.vmem [resolvable:$false] %s656_s7 }
  0x5d   : > { %p659_p5 = scmp.lt.s32.totalorder %s920_s5, %s657_s7 }
  0x60   : > { %265 = vrot.lane.b32.xlu1 %v226_v13, %s728_s9  ;;  %269 = vrot.lane.b32.xlu0 %v227_v15, %s728_s9  ;;  %s658_s9 = scalar_lea.vmem %s657_s7, 768 }
  0x61   : > { %p660_p10 = scmp.lt.s32.totalorder %s658_s9, %s652_s22 }
  0x63   : > { %p661_p2 = por %p660_p10, %p659_p5 }
  0x64   : > { %278 = vrot.lane.b32.xlu1 %v226_v13, %s731_s10  ;;  %276 = vrot.lane.b32.xlu0 %v215_v9, %s731_s10 }
  0x65   : > { %p662_p4 = pnand %p661_p2, %p655_p13 }
  0x68   : > { %283 = vrot.lane.b32.xlu1 %v861_v7, %s732_s11  ;;  %274 = vrot.lane.b32.xlu0 %v237_v17, %s731_s10 }
  0x6c   : > { %287 = vrot.lane.b32.xlu1 %v206_v14, %s732_s11  ;;  %285 = vrot.lane.b32.xlu0 %v207_v16, %s732_s11 }
  0x70   : > { %345 = vperm.xlu0 %619, %v189_v19  }
  0xb2   : > { %v231_v20 = vpop.permute.xlu1 %230  ;;  %v222_v21 = vpop.permute.xlu0 %221 }
  0xb3   : > { %v301_v28 = vsel %vm292_vm2, %v206_v14, %v222_v21 }
  0xb6   : > { %v218_v22 = vpop.permute.xlu1 %217  ;;  %v241_v23 = vpop.permute.xlu0 %240 }
  0xba   : > { %v220_v24 = vpop.permute.xlu0 %219  ;;  %v229_v25 = vpop.permute.xlu1 %228 }
  0xbb   : > { %v225_v26 = vsel %vm223_vm1, %v220_v24, %v222_v21  ;;  %v224_v27 = vsel %vm223_vm1, %v218_v22, %v220_v24  ;;  %v235_v36 = vsel %vm234_vm4, %v229_v25, %v231_v20 }
  0xbc   : > { %v298_v31 = vsel %vm292_vm2, %v207_v16, %v225_v26  ;;  %v295_v35 = vsel %vm292_vm2, %v861_v7, %v224_v27  ;;  %v188_v16 = vld [vmem:[%s963_s1] sm:$0xf] }
  0xbd   : > { %v304_v43 = vsel %vm302_vm6, %v295_v35, %v235_v36 }
  0xbe   : > { %v243_v29 = vpop.permute.xlu1 %242  ;;  %v233_v30 = vpop.permute.xlu0 %232 }
  0xbf   : > { %v246_v32 = vsel %vm244_vm3, %v241_v23, %v243_v29  ;;  %v236_v33 = vsel %vm234_vm4, %v231_v20, %v233_v30  ;;  %v308_v34 = vsel %vm302_vm6, %v301_v28, %v233_v30 }
  0xc0   : > { %v317_v37 = vsel %vm309_vm5, %v308_v34, %v243_v29  ;;  %v306_v38 = vsel %vm302_vm6, %v298_v31, %v236_v33 }
  0xc1   : > { %547 = vmatpush3.bf16.msra.mxu1 %v317_v37  ;;  %v314_v39 = vsel %vm309_vm5, %v306_v38, %v246_v32 }
  0xc2   : > { %v250_v40 = vpop.permute.xlu1 %249  ;;  %361 = vmatprep.subr.bf16.mxu0 %v314_v39  ;;  %v239_v41 = vpop.permute.xlu0 %238  ;;  %548 = vmatprep.subr.bf16.mxu1 %v724_v11 }
  0xc3   : > { %v245_v42 = vsel %vm244_vm3, %v239_v41, %v241_v23 }
  0xc4   : > { %v311_v44 = vsel %vm309_vm5, %v304_v43, %v245_v42 }
  0xc5   : > { %362 = vmatpush1.bf16.msra.mxu0 %v311_v44 }
  0xc6   : > { %v259_v45 = vpop.permute.xlu1 %258  ;;  %v252_v46 = vpop.permute.xlu0 %251 }
  0xc7   : > { %v255_v55 = vsel %vm253_vm9, %v250_v40, %v252_v46 }
  0xca   : > { %v248_v47 = vpop.permute.xlu1 %247  ;;  %v261_v48 = vpop.permute.xlu0 %260 }
  0xcb   : > { %v264_v53 = vsel %vm262_vm7, %v259_v45, %v261_v48  ;;  %v327_v56 = vsel %vm292_vm2, %v252_v46, %v261_v48  ;;  %v254_v3 = vsel %vm253_vm9, %v248_v47, %v250_v40 }
  0xcc   : > { %v324_v57 = vsel %vm292_vm2, %v255_v55, %v264_v53 }
  0xce   : > { %v268_v49 = vpop.permute.xlu1 %267  ;;  %v257_v50 = vpop.permute.xlu0 %256 }
  0xcf   : > { %v263_v61 = vsel %vm262_vm7, %v257_v50, %v259_v45 }
  0xd0   : > { %v321_v4 = vsel %vm292_vm2, %v254_v3, %v263_v61 }
  0xd2   : > { %v266_v51 = vpop.permute.xlu1 %265  ;;  %v270_v52 = vpop.permute.xlu0 %269 }
  0xd3   : > { %v273_v54 = vsel %vm271_vm8, %v268_v49, %v270_v52  ;;  %v333_v58 = vsel %vm302_vm6, %v327_v56, %v270_v52  ;;  %v272_v1 = vsel %vm271_vm8, %v266_v51, %v268_v49 }
  0xd4   : > { %v331_v0 = vsel %vm302_vm6, %v324_v57, %v273_v54  ;;  %v329_v8 = vsel %vm302_vm6, %v321_v4, %v272_v1 }
  0xd6   : > { %v279_v59 = vpop.permute.xlu1 %278  ;;  %v277_v60 = vpop.permute.xlu0 %276 }
  0xd7   : > { %v282_v62 = vsel %vm280_vm10, %v277_v60, %v279_v59  ;;  %v341_v63 = vsel %vm309_vm5, %v333_v58, %v279_v59 }
  0xd8   : > { %549 = vmatpush3.bf16.msra.mxu1 %v341_v63  ;;  %v338_v2 = vsel %vm309_vm5, %v331_v0, %v282_v62 }
  0xd9   : > { %363 = vmatprep.subr.bf16.mxu0 %v338_v2  ;;  %550 = vmatprep.subr.bf16.mxu1 %v724_v11 }
  0xda   : > { %v284_v5 = vpop.permute.xlu1 %283  ;;  %v275_v6 = vpop.permute.xlu0 %274 }
  0xdb   : > { %v281_v7 = vsel %vm280_vm10, %v275_v6, %v277_v60 }
  0xdc   : > { %v335_v9 = vsel %vm309_vm5, %v329_v8, %v281_v7 }
  0xdd   : > { %364 = vmatpush1.bf16.msra.mxu0 %v335_v9 }
  0xde   : > { %v288_v10 = vpop.permute.xlu1 %287  ;;  %v286_v12 = vpop.permute.xlu0 %285 }
  0xdf   : > { %v359_v13 = vsel %vm292_vm2, %v288_v10, 0  ;;  %v290_v14 = vsel %vm289_vm11, %v284_v5, %v286_v12  ;;  %v291_v11 = vsel %vm289_vm11, %v286_v12, %v288_v10 }
  0xe0   : > { %536 = vmatprep.subr.msk.bf16.mxu0 %vm292_vm2, %v291_v11  ;;  %551 = vmatpush3.bf16.msra.mxu1 %v359_v13  ;;  %v353_v15 = vsel %vm292_vm2, %v290_v14, 0 }
  0xe1   : > { %366 = vmatpush1.bf16.msra.mxu0 %v353_v15 }
  0xe3   : > { %553 = vmatmul.mubr.msk.bf16.vlgmr.msra.gmra.mrb[0].mxu1 %vm348_vm12, %v188_v16 }
  0xe4   : > { %537 = vmatmul.mubr.msk.bf16.vlgmr.msra.gmra.mrb[0].mxu0 %vm348_vm12, %v188_v16 }
  0xef   : > { %v346_v17 = vpop.permute.xlu0 %345 }
 0x1b6   : > { %v436_v18 = vpop.f32.mrb[0].mxu1 }
 0x1b7   : > { %v437_v19 = vadd.f32 %v436_v18, %v346_v17  ;;  %v395_v20 = vpop.f32.mrb[0].mxu0  ;;  %v554_v21 = vpop.f32.mrb[1].mxu1 }
 0x1b8   : > { %v396_v22 = vadd.f32 %v395_v20, %v346_v17  ;;  %v397_v23 = vpop.f32.mrb[1].mxu0  ;;  %v439_v24 = vpop.f32.mrb[2].mxu1 }
 0x1b9   : > { %v398_v25 = vadd.f32 %v397_v23, %v346_v17  ;;  %v399_v26 = vpop.f32.mrb[2].mxu0  ;;  %v555_v27 = vpop.f32.mrb[3].mxu1  ;;  %445 = vst.msk [vmem:[%s186_s29 + $0x10] sm:$0xff] %vm444_vm13, %v437_v19 }
 0x1ba   : > { %442 = vst [vmem:[%s186_s29] sm:$0xff] %v396_v22  ;;  %v400_v28 = vpop.f32.mrb[3].mxu0 }
 0x1bb   : > { %443 = vst [vmem:[%s186_s29 + $0x8] sm:$0xff] %v398_v25 }
 0x1bc   : > { %665 = shalt.err (!%p662_p4)
}
 0x1bd   : > { %s666_s28 = scalar_lea.hbm %s918_s16, 384  ;;  %s670_s17 = scalar_lea.hbm %s965_s3, 768 }
 0x1be   : > { %p667_p7 = scmp.ne.s32.totalorder %s918_s16, %s666_s28  ;;  %p671_p0 = scmp.lt.u32.totalorder %s918_s16, %s965_s3 }
 0x1bf   : > { %p672_p1 = scmp.lt.u32.totalorder %s670_s17, %s666_s28  ;;  %p674_p6 = scmp.lt.u32.totalorder %s666_s28, %s918_s16 }
 0x1c0   : > { %p668_p8 = pnand %p667_p7, %p973_p11 }
 0x1c1   : > { %p673_p3 = por %p672_p1, %p671_p0 }
 0x1c2   : > { %p669_p9 = pneg %p668_p8 }
 0x1c3   : > { %p675_p12 = por %p674_p6, %p673_p3 }
 0x1c5   : > { %p676_p13 = pnand %p675_p12, %p669_p9 }
 0x1c7   : > { %679 = shalt.err (!%p676_p13)
}
 0x1c8   : > { %563 = dma.vmem_to_hbm [thread:$0]  (%p973_p11), %s920_s5, 384, %s918_s16, %s447_s4  }
 0x1c9 PF: > { %s473_s25 = sand.u32 1, %s706_s12   ;;  %p974_p5 = scmp.ne.s32.totalorder %s969_s24, 0 }
 0x1ca   : > { %p975_p10 = scmp.ge.s32.totalorder %s718_s15, 2  ;;  %s474_s26 = scalar_lea.sflag [#allocation4], %s473_s25 }
 0x1cc   : > { %p570_p2 = pnand %p975_p10, %p974_p5 }
 0x1ce   : > { %701 = dma.done.wait (!%p570_p2), %s474_s26, 384  }
 0x1cf   : > { %703 = vsyncadd (!%p570_p2), %s474_s26, 4294966912  ;;  %p16_p4 = scmp.ge.s32.totalorder %s779_s18, 4   ;;  %s976_s12 = smov %s710_s13 }
 0x1d0   : > { %s977_s13 = smov %s714_s14  ;;  %s978_s14 = smov %s791_s21 }
 0x1d1   : > { %s979_s15 = smov %s779_s18  ;;  %18 = sbr.rel (!%p16_p4) target bundleno = 5 (0x5), region = 77 }
 0x1d8   :  { %479 = vsyncpa [#allocation3], 1 }
 0x1d9   :  { %481 = vsyncpa [#allocation3 + $0x1], 1 }
 0x1da   :  { %482 = vsyncpa [#allocation4], 1 }
 0x1db   :  { %484 = vsyncpa [#allocation4 + $0x1], 1 }

</bundles_post_ra>
